<compile_context>
chip_gen: v6e
topology: v6e:2x2x1
jax: 0.10.0
libtpu: 0.0.40
codegen_flags: <defaults>
</compile_context>

<pallas_src>
import jax
import jax.numpy as jnp
from jax.experimental import pallas as pl
from jax.experimental.pallas import tpu as pltpu

_LANE = 128
_SUBLANE = 8
# Per-buffer block budget. in + out, double-buffered => ~4x this in VMEM, which is
# comfortably under the default scoped VMEM on v5e (16 MiB), v6e/v7x (32 MiB).
_MAX_BLOCK_BYTES = 2 * 1024 * 1024


def _identity_kernel(x_ref, o_ref):
    # Straight VMEM tile copy — exact identity semantics (shape & dtype preserved).
    o_ref[...] = x_ref[...]


def _single_block_copy(x):
    """Whole array as one block (no grid). For small inputs."""
    return pl.pallas_call(
        _identity_kernel,
        out_shape=jax.ShapeDtypeStruct(x.shape, x.dtype),
        input_output_aliases={0: 0},
    )(x)


def _tiled_copy_2d(x2d):
    """Large lane-dense (rows, 128) copy: big row tiles, parallel axis for v7x's 2 TCs."""
    rows, lanes = x2d.shape
    itemsize = jnp.dtype(x2d.dtype).itemsize
    rows_per_block = _MAX_BLOCK_BYTES // (lanes * itemsize)
    rows_per_block = max(_SUBLANE, (rows_per_block // _SUBLANE) * _SUBLANE)
    rows_per_block = min(rows_per_block, rows)
    grid = (pl.cdiv(rows, rows_per_block),)
    spec = pl.BlockSpec((rows_per_block, lanes), lambda i: (i, 0))
    return pl.pallas_call(
        _identity_kernel,
        out_shape=jax.ShapeDtypeStruct(x2d.shape, x2d.dtype),
        grid=grid,
        in_specs=[spec],
        out_specs=spec,
        input_output_aliases={0: 0},
        compiler_params=pltpu.CompilerParams(
            dimension_semantics=("parallel",),
        ),
    )(x2d)


def net_forward(x):
    """Pallas implementation of Net.forward (identity)."""
    orig_shape = x.shape
    total = x.size
    itemsize = jnp.dtype(x.dtype).itemsize

    if total % _LANE != 0:
        # Odd size: keep original shape, single full-extent block (still correct).
        return _single_block_copy(x)

    # Lane-dense 2D view of the (contiguous) NCHW tensor.
    x2d = x.reshape(total // _LANE, _LANE)

    if total * itemsize <= _MAX_BLOCK_BYTES:
        y2d = _single_block_copy(x2d)
    else:
        y2d = _tiled_copy_2d(x2d)

    return y2d.reshape(orig_shape)


if __name__ == "__main__":
    key = jax.random.PRNGKey(0)
    # Small NCHW input consistent with a conv-style module: batch=2, channels=4, 16x16 spatial.
    x = jax.random.normal(key, (2, 4, 16, 16), dtype=jnp.float32)

    # Host snapshot for verification (robust even if the input buffer gets aliased/donated).
    x_host = jax.device_get(x)

    y = net_forward(x)
    y = jax.block_until_ready(y)

    assert y.shape == x_host.shape and y.dtype == x_host.dtype
    assert bool(jnp.array_equal(y, jnp.asarray(x_host)))

    print("KERNEL_OK")
</pallas_src>

<mosaic_0001>
module attributes {stable_mosaic.version = 11 : i64} {
  func.func @_identity_kernel(%arg0: memref<16x128xf32, #tpu.memory_space<vmem>>, %arg1: memref<16x128xf32, #tpu.memory_space<vmem>>) attributes {dimension_semantics = [], scalar_prefetch = 0 : i64, scratch_operands = 0 : i64, tpu.core_type = #tpu.core_type<tc>} {
    %c0 = arith.constant 0 : index
    %c0_0 = arith.constant 0 : index
    %0 = vector.load %arg0[%c0, %c0_0] : memref<16x128xf32, #tpu.memory_space<vmem>>, vector<16x128xf32>
    %c0_1 = arith.constant 0 : index
    %c0_2 = arith.constant 0 : index
    %1 = vector.load %arg1[%c0_1, %c0_2] : memref<16x128xf32, #tpu.memory_space<vmem>>, vector<16x128xf32>
    tpu.vector_store %arg1[%c0_1, %c0_2], %0 {strides = array<i32>} : memref<16x128xf32, #tpu.memory_space<vmem>>, vector<16x128xf32>,
    return
  }
}

</mosaic_0001>

<bundles_post_ra>
// kernel: tpu_custom_call.1
= control target key start
LH: loop header
LB: loop body
LE: loop exit
PB: predicated region body
PF: predicated region fallthrough
CT: control target
= control target key end

     0   :  { %6 = vsyncpa [#allocation3], 0  ;;  %s112_s0 = inlined_call_operand.hbm [shape: f32[16,128], index: 0, kind: input, shape index: {}, may-alias: {0,1}]   ;;  %s113_s1 = inlined_call_operand.hbm [shape: f32[16,128], index: 1, kind: output, shape index: {}, may-alias: {0,1}]  }
   0x1   :  { %7 = vsyncpa [#allocation4], 0  ;;  %s92_s6 = smov [#allocation2]  }
   0x2   :  { %s13_s7 = sshll.u32 %s92_s6, 4  ;;  %s14_s7 = int_to_ptr.vmem [resolvable:$true] %s13_s7 }
   0x3   :  { %s56_s8 = scalar_lea.vmem %s14_s7, 256  ;;  %p61_p1 = scmp.lt.s32.totalorder %s14_s7, %s14_s7 }
   0x4   :  { %p57_p0 = scmp.ne.s32.totalorder %s14_s7, %s56_s8  ;;  %p62_p2 = scmp.lt.s32.totalorder %s56_s8, %s56_s8 }
   0x6   :  { %p63_p3 = por %p62_p2, %p61_p1 }
   0x8   :  { %p64_p4 = pnand %p63_p3, %p57_p0 }
   0xa   :  { %67 = shalt.err (!%p64_p4)
}
   0xb   :  { %s93_s9 = smov 128   ;;  %s94_s10 = smov 8  }
   0xc   :  { %19 = dma.hbm_to_vmem [thread:$0]  %s112_s0, 256, %s14_s7, [#allocation3], %s93_s9, %s93_s9, %s94_s10  }
   0xd   :  { %88 = dma.done.wait [#allocation3], 256  }
   0xe   :  { %89 = vsyncadd [#allocation3], 4294967040  ;;  %s95_s13 = smov [#allocation5]   ;;  %v23_v0 = vld [vmem:[#allocation2] sm:$0xff]  ;;  %v24_v1 = vld [vmem:[#allocation2 + $0x8] sm:$0xff] }
   0xf   :  { %s32_s14 = sshll.u32 %s95_s13, 4  ;;  %25 = vst [vmem:[#allocation5] sm:$0xff] %v23_v0  ;;  %26 = vst [vmem:[#allocation5 + $0x8] sm:$0xff] %v24_v1  ;;  %s33_s14 = int_to_ptr.vmem [resolvable:$true] %s32_s14 }
  0x10   :  { %s68_s15 = scalar_lea.vmem %s33_s14, 256  ;;  %p73_p6 = scmp.lt.s32.totalorder %s33_s14, %s33_s14 }
  0x11   :  { %p69_p5 = scmp.ne.s32.totalorder %s33_s14, %s68_s15  ;;  %p74_p7 = scmp.lt.s32.totalorder %s68_s15, %s68_s15 }
  0x13   :  { %p75_p8 = por %p74_p7, %p73_p6 }
  0x15   :  { %p76_p9 = pnand %p75_p8, %p69_p5 }
  0x17   :  { %79 = shalt.err (!%p76_p9)
}
  0x18   :  { %38 = dma.vmem_to_hbm [thread:$0]  %s33_s14, 256, %s113_s1, [#allocation4], %s93_s9, %s93_s9, %s94_s10  }
  0x19   :  { %90 = dma.done.wait [#allocation4], 256  }
  0x1a   :  { %91 = vsyncadd [#allocation4], 4294967040 }
  0x1b   :  { %42 = vsyncpa [#allocation3], 1 }
  0x1c   :  { %43 = vsyncpa [#allocation4], 1 }

</bundles_post_ra>
